<compile_context>
chip_gen: v6e
topology: v6e:2x2x1
jax: 0.10.0
libtpu: 0.0.40
codegen_flags: <defaults>
</compile_context>

<pallas_src>
import jax
import jax.numpy as jnp
from jax.experimental import pallas as pl
from jax.experimental.pallas import tpu as pltpu


D_IN, H1, H2, D_OUT = 3, 80, 20, 2

# Approximate per-batch-row (per-lane) f32 VMEM footprint with the
# feature-major layout (sublane-padded, double-buffered x/out included):
#   x (3->8 subl, x2 buf) 64 B + out (2->8, x2) 64 B
#   h1 (80) 320 B + h2 (20->24) 96 B + fc3 acc (2->8) 32 B  => ~576 B, +slack
_PER_ROW_VMEM_BYTES = 640
_TB_HARD_CAP = 16384           # ~10 MiB working set: safe even on v7x (64 MiB VMEM)


def _round_up(n, m):
    return ((n + m - 1) // m) * m


def _vmem_capacity_bytes(default=64 * 1024 * 1024):
    """Device VMEM capacity; default to the smallest (v7x) if the query fails."""
    try:
        cap = getattr(pltpu.get_tpu_info(), "vmem_capacity_bytes", None)
        if cap:
            return int(cap)
    except Exception:
        pass
    return default


def mlp_kernel(x_ref, w1_ref, b1_ref, w2_ref, b2_ref, w3_ref, b3_ref, o_ref):
    # One lane-dense batch tile per grid step; weights/biases are resident.
    x = x_ref[...]                                                     # (3, TB)
    h1 = jnp.dot(w1_ref[...], x, preferred_element_type=jnp.float32) + b1_ref[...]
    h1 = jnp.maximum(h1, 0.0)                                          # (80, TB)
    h2 = jnp.dot(w2_ref[...], h1, preferred_element_type=jnp.float32) + b2_ref[...]
    h2 = jnp.maximum(h2, 0.0)                                          # (20, TB)
    o_ref[...] = (jnp.dot(w3_ref[...], h2, preferred_element_type=jnp.float32)
                  + b3_ref[...]).astype(o_ref.dtype)                   # (2, TB)


def test_cnn_forward(x, params, *, block_b=None):
    """x: [B, 3] f32 -> [B, 2].  params: PyTorch-layout w* [out, in], b* [out, 1]."""
    B = x.shape[0]

    # Feature-major view for lane-dense blocks (layout plumbing, not compute).
    xT = x.T                                                           # (3, B)

    # ---- auto-size the batch tile from device VMEM -------------------------
    vmem_cap = _vmem_capacity_bytes()
    budget = int(0.25 * vmem_cap)                       # tile working-set budget
    tb_cap = max(128, (budget // _PER_ROW_VMEM_BYTES) // 128 * 128)
    tb_cap = min(tb_cap, _TB_HARD_CAP)

    if block_b is not None:
        # Caller override (must be a multiple of 128 unless it covers all of B).
        TB = B if block_b >= B else _round_up(block_b, 128)
    elif B <= 512:
        TB = B                                          # single full-array block
    else:
        # >=2 grid steps so the "parallel" axis shards across both TCs on v7x.
        TB = min(tb_cap, _round_up(pl.cdiv(B, 2), 128))

    grid = (pl.cdiv(B, TB),)                            # partial tail handled by Pallas

    def batch_spec(rows):
        return pl.BlockSpec((rows, TB), lambda i: (0, i))

    def const_spec(shape):
        return pl.BlockSpec(shape, lambda i: (0, 0))

    flops = 2 * B * (D_IN * H1 + H1 * H2 + H2 * D_OUT)
    weight_bytes = 4 * (D_IN * H1 + H1 + H1 * H2 + H2 + H2 * D_OUT + D_OUT)
    bytes_accessed = 4 * B * (D_IN + D_OUT) + weight_bytes

    outT = pl.pallas_call(
        mlp_kernel,
        out_shape=jax.ShapeDtypeStruct((D_OUT, B), jnp.float32),
        grid=grid,
        in_specs=[
            batch_spec(D_IN),                                     # x tile (3, TB)
            const_spec((H1, D_IN)), const_spec((H1, 1)),          # fc1 (resident)
            const_spec((H2, H1)), const_spec((H2, 1)),            # fc2 (resident)
            const_spec((D_OUT, H2)), const_spec((D_OUT, 1)),      # fc3 (resident)
        ],
        out_specs=batch_spec(D_OUT),                              # (2, TB) lane-dense
        compiler_params=pltpu.CompilerParams(
            dimension_semantics=("parallel",),          # megacore sharding on v7x
            vmem_limit_bytes=min(int(0.5 * vmem_cap), 96 * 1024 * 1024),
        ),
        cost_estimate=pl.CostEstimate(
            flops=flops, transcendentals=0, bytes_accessed=bytes_accessed),
    )(xT, params["w1"], params["b1"], params["w2"], params["b2"],
      params["w3"], params["b3"])

    return outT.T                                                 # back to [B, 2]


def init_params(key):
    """nn.Linear default init: U(-1/sqrt(fan_in), +1/sqrt(fan_in)); PyTorch [out, in] layout."""
    def linear(key, fan_in, fan_out):
        kw, kb = jax.random.split(key)
        bound = 1.0 / jnp.sqrt(fan_in)
        w = jax.random.uniform(kw, (fan_out, fan_in), jnp.float32, -bound, bound)
        b = jax.random.uniform(kb, (fan_out, 1), jnp.float32, -bound, bound)
        return w, b

    k1, k2, k3 = jax.random.split(key, 3)
    w1, b1 = linear(k1, D_IN, H1)
    w2, b2 = linear(k2, H1, H2)
    w3, b3 = linear(k3, H2, D_OUT)
    return dict(w1=w1, b1=b1, w2=w2, b2=b2, w3=w3, b3=b3)


def reference_forward(x, p):
    h1 = jnp.maximum(x @ p["w1"].T + p["b1"].T, 0.0)
    h2 = jnp.maximum(h1 @ p["w2"].T + p["b2"].T, 0.0)
    return h2 @ p["w3"].T + p["b3"].T


if __name__ == "__main__":
    key = jax.random.PRNGKey(0)
    k_p, k_x1, k_x2 = jax.random.split(key, 3)
    params = init_params(k_p)

    fwd = jax.jit(test_cnn_forward, static_argnames=("block_b",))

    # Small canonical test: B=8 -> single full-array block.
    B = 8
    x = jax.random.normal(k_x1, (B, 3), jnp.float32)
    out = jax.block_until_ready(fwd(x, params))
    ref = reference_forward(x, params)
    assert out.shape == (B, 2), out.shape
    # Tolerance loosened vs exact: kernel contracts as W@X (transposed form),
    # so MXU accumulation order differs slightly from the reference X@W^T.
    assert jnp.allclose(out, ref, atol=1e-4, rtol=1e-4), "mismatch vs JAX reference (B=8)"

    # Multi-step grid + Pallas-masked partial tail block (200 = 128 + 72).
    B2 = 200
    x2 = jax.random.normal(k_x2, (B2, 3), jnp.float32)
    out2 = jax.block_until_ready(fwd(x2, params, block_b=128))
    ref2 = reference_forward(x2, params)
    assert out2.shape == (B2, 2), out2.shape
    assert jnp.allclose(out2, ref2, atol=1e-4, rtol=1e-4), "mismatch vs JAX reference (B=200)"

    print("KERNEL_OK")
</pallas_src>

<mosaic_0001>
module attributes {stable_mosaic.version = 11 : i64} {
  func.func @mlp_kernel(%arg0: i32, %arg1: memref<3x8xf32, #tpu.memory_space<vmem>>, %arg2: memref<80x3xf32, #tpu.memory_space<vmem>>, %arg3: memref<80x1xf32, #tpu.memory_space<vmem>>, %arg4: memref<20x80xf32, #tpu.memory_space<vmem>>, %arg5: memref<20x1xf32, #tpu.memory_space<vmem>>, %arg6: memref<2x20xf32, #tpu.memory_space<vmem>>, %arg7: memref<2x1xf32, #tpu.memory_space<vmem>>, %arg8: memref<2x8xf32, #tpu.memory_space<vmem>>) attributes {dimension_semantics = [#tpu.dimension_semantics<parallel>], iteration_bounds = array<i64: 1>, scalar_prefetch = 0 : i64, scratch_operands = 0 : i64, tpu.core_type = #tpu.core_type<tc>, window_params = [{transform_indices = @transform_0, window_bounds = array<i64: 3, 8>}, {pipeline_mode = #tpu.pipeline_mode<synchronous>, transform_indices = @transform_1, window_bounds = array<i64: 80, 3>}, {pipeline_mode = #tpu.pipeline_mode<synchronous>, transform_indices = @transform_2, window_bounds = array<i64: 80, 1>}, {pipeline_mode = #tpu.pipeline_mode<synchronous>, transform_indices = @transform_3, window_bounds = array<i64: 20, 80>}, {pipeline_mode = #tpu.pipeline_mode<synchronous>, transform_indices = @transform_4, window_bounds = array<i64: 20, 1>}, {pipeline_mode = #tpu.pipeline_mode<synchronous>, transform_indices = @transform_5, window_bounds = array<i64: 2, 20>}, {pipeline_mode = #tpu.pipeline_mode<synchronous>, transform_indices = @transform_6, window_bounds = array<i64: 2, 1>}, {transform_indices = @transform_7, window_bounds = array<i64: 2, 8>}]} {
    %c0 = arith.constant 0 : index
    %c0_0 = arith.constant 0 : index
    %0 = vector.load %arg1[%c0, %c0_0] : memref<3x8xf32, #tpu.memory_space<vmem>>, vector<3x8xf32>
    %c0_1 = arith.constant 0 : index
    %c0_2 = arith.constant 0 : index
    %1 = vector.load %arg2[%c0_1, %c0_2] : memref<80x3xf32, #tpu.memory_space<vmem>>, vector<80x3xf32>
    %cst = arith.constant dense<0.000000e+00> : vector<80x8xf32>
    %2 = tpu.matmul %1, %0, %cst {dimension_numbers = #tpu.dot_dimension_numbers<[1], [0], [0], [1], [0, 0, 1, 1], [], []>} : vector<80x3xf32>, vector<3x8xf32>, vector<80x8xf32> -> vector<80x8xf32>
    %c0_3 = arith.constant 0 : index
    %c0_4 = arith.constant 0 : index
    %3 = vector.load %arg3[%c0_3, %c0_4] : memref<80x1xf32, #tpu.memory_space<vmem>>, vector<80x1xf32>
    %4 = vector.broadcast %3 : vector<80x1xf32> to vector<80x8xf32>
    %5 = arith.addf %2, %4 : vector<80x8xf32>
    %cst_5 = arith.constant 0.000000e+00 : f32
    %6 = vector.broadcast %cst_5 : f32 to vector<80x8xf32>
    %7 = arith.maximumf %5, %6 : vector<80x8xf32>
    %c0_6 = arith.constant 0 : index
    %c0_7 = arith.constant 0 : index
    %8 = vector.load %arg4[%c0_6, %c0_7] : memref<20x80xf32, #tpu.memory_space<vmem>>, vector<20x80xf32>
    %cst_8 = arith.constant dense<0.000000e+00> : vector<20x8xf32>
    %9 = tpu.matmul %8, %7, %cst_8 {dimension_numbers = #tpu.dot_dimension_numbers<[1], [0], [0], [1], [0, 0, 1, 1], [], []>} : vector<20x80xf32>, vector<80x8xf32>, vector<20x8xf32> -> vector<20x8xf32>
    %c0_9 = arith.constant 0 : index
    %c0_10 = arith.constant 0 : index
    %10 = vector.load %arg5[%c0_9, %c0_10] : memref<20x1xf32, #tpu.memory_space<vmem>>, vector<20x1xf32>
    %11 = vector.broadcast %10 : vector<20x1xf32> to vector<20x8xf32>
    %12 = arith.addf %9, %11 : vector<20x8xf32>
    %cst_11 = arith.constant 0.000000e+00 : f32
    %13 = vector.broadcast %cst_11 : f32 to vector<20x8xf32>
    %14 = arith.maximumf %12, %13 : vector<20x8xf32>
    %c0_12 = arith.constant 0 : index
    %c0_13 = arith.constant 0 : index
    %15 = vector.load %arg6[%c0_12, %c0_13] : memref<2x20xf32, #tpu.memory_space<vmem>>, vector<2x20xf32>
    %cst_14 = arith.constant dense<0.000000e+00> : vector<2x8xf32>
    %16 = tpu.matmul %15, %14, %cst_14 {dimension_numbers = #tpu.dot_dimension_numbers<[1], [0], [0], [1], [0, 0, 1, 1], [], []>} : vector<2x20xf32>, vector<20x8xf32>, vector<2x8xf32> -> vector<2x8xf32>
    %c0_15 = arith.constant 0 : index
    %c0_16 = arith.constant 0 : index
    %17 = vector.load %arg7[%c0_15, %c0_16] : memref<2x1xf32, #tpu.memory_space<vmem>>, vector<2x1xf32>
    %18 = vector.broadcast %17 : vector<2x1xf32> to vector<2x8xf32>
    %19 = arith.addf %16, %18 : vector<2x8xf32>
    %c0_17 = arith.constant 0 : index
    %c0_18 = arith.constant 0 : index
    %20 = vector.load %arg8[%c0_17, %c0_18] : memref<2x8xf32, #tpu.memory_space<vmem>>, vector<2x8xf32>
    tpu.vector_store %arg8[%c0_17, %c0_18], %19 {strides = array<i32>} : memref<2x8xf32, #tpu.memory_space<vmem>>, vector<2x8xf32>,
    return
  }
  func.func @transform_0(%arg0: i32) -> (i32, i32) {
    %c0_i32 = arith.constant 0 : i32
    %c0_i32_0 = arith.constant 0 : i32
    return %c0_i32, %arg0 : i32, i32
  }
  func.func @transform_1(%arg0: i32) -> (i32, i32) {
    %c0_i32 = arith.constant 0 : i32
    %c0_i32_0 = arith.constant 0 : i32
    %c0_i32_1 = arith.constant 0 : i32
    return %c0_i32, %c0_i32_0 : i32, i32
  }
  func.func @transform_2(%arg0: i32) -> (i32, i32) {
    %c0_i32 = arith.constant 0 : i32
    %c0_i32_0 = arith.constant 0 : i32
    %c0_i32_1 = arith.constant 0 : i32
    return %c0_i32, %c0_i32_0 : i32, i32
  }
  func.func @transform_3(%arg0: i32) -> (i32, i32) {
    %c0_i32 = arith.constant 0 : i32
    %c0_i32_0 = arith.constant 0 : i32
    %c0_i32_1 = arith.constant 0 : i32
    return %c0_i32, %c0_i32_0 : i32, i32
  }
  func.func @transform_4(%arg0: i32) -> (i32, i32) {
    %c0_i32 = arith.constant 0 : i32
    %c0_i32_0 = arith.constant 0 : i32
    %c0_i32_1 = arith.constant 0 : i32
    return %c0_i32, %c0_i32_0 : i32, i32
  }
  func.func @transform_5(%arg0: i32) -> (i32, i32) {
    %c0_i32 = arith.constant 0 : i32
    %c0_i32_0 = arith.constant 0 : i32
    %c0_i32_1 = arith.constant 0 : i32
    return %c0_i32, %c0_i32_0 : i32, i32
  }
  func.func @transform_6(%arg0: i32) -> (i32, i32) {
    %c0_i32 = arith.constant 0 : i32
    %c0_i32_0 = arith.constant 0 : i32
    %c0_i32_1 = arith.constant 0 : i32
    return %c0_i32, %c0_i32_0 : i32, i32
  }
  func.func @transform_7(%arg0: i32) -> (i32, i32) {
    %c0_i32 = arith.constant 0 : i32
    %c0_i32_0 = arith.constant 0 : i32
    return %c0_i32, %arg0 : i32, i32
  }
}

</mosaic_0001>

<bundles_post_ra>
// kernel: test_cnn_forward.1
= control target key start
LH: loop header
LB: loop body
LE: loop exit
PB: predicated region body
PF: predicated region fallthrough
CT: control target
= control target key end

     0   :  { %vm129_vm0 = vcmask 1042432   ;;  %vm98_vm1 = vcmask 23552   ;;  %v600_v4 = vmov 0   ;;  %s765_s0 = inlined_call_operand.vmem [shape: f32[3,8], index: 0, kind: input, shape index: {}]   ;;  %s766_s1 = inlined_call_operand.vmem [shape: f32[80,3], index: 1, kind: input, shape index: {}]   ;;  %s767_s2 = inlined_call_operand.vmem [shape: f32[80,1], index: 2, kind: input, shape index: {}]   ;;  %s768_s3 = inlined_call_operand.vmem [shape: f32[20,80], index: 3, kind: input, shape index: {}]   ;;  %s769_s4 = inlined_call_operand.vmem [shape: f32[20,1], index: 4, kind: input, shape index: {}]   ;;  %s770_s5 = inlined_call_operand.vmem [shape: f32[2,20], index: 5, kind: input, shape index: {}]   ;;  %s771_s6 = inlined_call_operand.vmem [shape: f32[2,1], index: 6, kind: input, shape index: {}]   ;;  %s772_s7 = inlined_call_operand.hbm [shape: f32[2,8], index: 7, kind: output, shape index: {}]  }
   0x1   :  { %v27_v0 = vld [vmem:[%s765_s0] sm:$0x7]  ;;  %v29_v2 = vld [vmem:[%s766_s1 + $0x8] sm:$0xff]  ;;  %v30_v3 = vld [vmem:[%s766_s1 + $0x10] sm:$0xff]  ;;  %576 = vset.pattern.permute.xlu0 %v600_v4  ;;  %577 = vset.pattern.permute.xlu1 %v600_v4 }
   0x2   :  { %v28_v1 = vld [vmem:[%s766_s1] sm:$0xff]  ;;  %517 = vmatprep.subr.msk.mxu0 %vm129_vm0, %v27_v0  ;;  %v47_v5 = vld [vmem:[%s767_s2 + $0x48] sm:$0xff]  ;;  %v31_v6 = vld [vmem:[%s766_s1 + $0x18] sm:$0xff] }
   0x3   :  { %519 = vmatprep.mubr.msk.f32.mxu0 %vm98_vm1, %v28_v1  ;;  %518 = vmatpush3.msk.msra.mxu0 %vm129_vm0, %v27_v0  ;;  %v45_v7 = vld [vmem:[%s767_s2 + $0x38] sm:$0xff]  ;;  %v32_v8 = vld [vmem:[%s766_s1 + $0x20] sm:$0xff]  ;;  %v44_v10 = vld [vmem:[%s767_s2 + $0x30] sm:$0xff] }
   0x4   :  { %520 = vmatmul.mubr.msk.f32.vlgmr.msra.gmra.mxu0 %vm98_vm1, %v29_v2  ;;  %95 = vperm.xlu0 %576, %v47_v5   ;;  %v46_v9 = vld [vmem:[%s767_s2 + $0x40] sm:$0xff]  ;;  %v33_v11 = vld [vmem:[%s766_s1 + $0x28] sm:$0xff] }
   0x5   :  { %522 = vmatprep.mubr.msk.f32.mxu0 %vm98_vm1, %v30_v3  ;;  %85 = vperm.xlu1 %577, %v45_v7  }
   0x8   :  { %523 = vmatmul.mubr.msk.f32.gmra.mxu0 %vm98_vm1, %v31_v6  ;;  %90 = vperm.xlu0 %576, %v46_v9  }
   0x9   :  { %525 = vmatprep.mubr.msk.f32.mxu0 %vm98_vm1, %v32_v8 }
   0xa   :  { %12 = vsyncpa [#allocation3], 0  ;;  %v34_v12 = vld [vmem:[%s766_s1 + $0x30] sm:$0xff]  ;;  %80 = vperm.xlu1 %577, %v44_v10   ;;  %v43_v13 = vld [vmem:[%s767_s2 + $0x28] sm:$0xff]  ;;  %v601_v26 = vmov 0.0   ;;  %vm602_vm2 = vmmov 0  }
   0xb   :  { %v42_v14 = vld [vmem:[%s767_s2 + $0x20] sm:$0xff]  ;;  %v35_v15 = vld [vmem:[%s766_s1 + $0x38] sm:$0xff]  ;;  %v40_v18 = vld [vmem:[%s767_s2 + $0x10] sm:$0xff]  ;;  %534 = vmatprep.subr.mxu1 %v601_v26  ;;  %563 = vmatprep.subr.mxu0 %v601_v26  ;;  %vm279_vm3 = vcmask 654336   ;;  %vm383_vm4 = vcmask 1043456   ;;  %vm379_vm5 = vcmask 162816  }
   0xc   :  { %526 = vmatmul.mubr.msk.f32.gmra.mxu0 %vm98_vm1, %v33_v11  ;;  %75 = vperm.xlu0 %576, %v43_v13   ;;  %v36_v16 = vld [vmem:[%s766_s1 + $0x40] sm:$0xff]  ;;  %v41_v17 = vld [vmem:[%s767_s2 + $0x18] sm:$0xff]  ;;  %v37_v19 = vld [vmem:[%s766_s1 + $0x48] sm:$0xff]  ;;  %s603_s29 = smov [#allocation2]   ;;  %vm457_vm6 = vcmask 58368  }
   0xd   :  { %528 = vmatprep.mubr.msk.f32.mxu0 %vm98_vm1, %v34_v12  ;;  %v39_v20 = vld [vmem:[%s767_s2 + $0x8] sm:$0xff]  ;;  %v38_v21 = vld [vmem:[%s767_s2] sm:$0xff]  ;;  %v263_v22 = vld [vmem:[%s769_s4 + $0x10] sm:$0xf]  ;;  %554 = vmatprep.mubr.msk.f32.mxu1 %vm602_vm2, %v601_v26  ;;  %s465_s30 = sshll.u32 %s603_s29, 4  ;;  %s466_s30 = int_to_ptr.vmem [resolvable:$true] %s465_s30 }
   0xe   :  { %70 = vperm.xlu1 %577, %v42_v14   ;;  %v262_v23 = vld [vmem:[%s769_s4 + $0x8] sm:$0xff]  ;;  %v261_v24 = vld [vmem:[%s769_s4] sm:$0xff]  ;;  %v260_v5 = vld [vmem:[%s768_s3 + $0x10] sm:$0xf]  ;;  %s578_s8 = scalar_lea.vmem %s466_s30, 32  ;;  %p583_p1 = scmp.lt.s32.totalorder %s466_s30, %s466_s30 }
   0xf   :  { %v373_v25 = vld [vmem:[%s771_s6] sm:$0x3]  ;;  %v259_v4 = vld [vmem:[%s768_s3 + $0x8] sm:$0xff]  ;;  %p579_p0 = scmp.ne.s32.totalorder %s466_s30, %s578_s8  ;;  %p584_p2 = scmp.lt.s32.totalorder %s578_s8, %s578_s8 }
  0x10   :  { %529 = vmatmul.mubr.msk.f32.gmra.mxu0 %vm98_vm1, %v35_v15  ;;  %65 = vperm.xlu0 %576, %v41_v17   ;;  %v258_v3 = vld [vmem:[%s768_s3] sm:$0xff] }
  0x11   :  { %531 = vmatprep.mubr.msk.f32.mxu0 %vm98_vm1, %v36_v16  ;;  %p585_p3 = por %p584_p2, %p583_p1 }
  0x12   :  { %60 = vperm.xlu1 %577, %v40_v18  }
  0x13   :  { %p586_p4 = pnand %p585_p3, %p579_p0 }
  0x14   :  { %532 = vmatmul.mubr.msk.f32.gmra.mxu0 %vm98_vm1, %v37_v19  ;;  %55 = vperm.xlu0 %576, %v39_v20  }
  0x15   :  { %569 = vmatprep.mubr.msk.f32.mxu0 %vm602_vm2, %v601_v26 }
  0x16   :  { %50 = vperm.xlu1 %577, %v38_v21   ;;  %v372_v21 = vld [vmem:[%s770_s5] sm:$0x3] }
  0x18   :  { %276 = vperm.xlu0 %576, %v263_v22  }
  0x1a   :  { %271 = vperm.xlu1 %577, %v262_v23  }
  0x1c   :  { %266 = vperm.xlu0 %576, %v261_v24  }
  0x1e   :  { %376 = vperm.xlu1 %577, %v373_v25  }
  0x7f   :  { %v96_v29 = vpop.permute.xlu0 %95 }
  0x80   :  { %v86_v31 = vpop.permute.xlu1 %85 }
  0x83   :  { %v91_v34 = vpop.permute.xlu0 %90 }
  0x85   :  { %v81_v36 = vpop.permute.xlu1 %80 }
  0x87   :  { %v76_v39 = vpop.permute.xlu0 %75 }
  0x89   :  { %v71_v42 = vpop.permute.xlu1 %70 }
  0x8b   :  { %v66_v49 = vpop.permute.xlu0 %65 }
  0x8d   :  { %v61_v52 = vpop.permute.xlu1 %60 }
  0x8f   :  { %v56_v57 = vpop.permute.xlu0 %55 }
  0x91   :  { %v51_v60 = vpop.permute.xlu1 %50 }
  0x93   :  { %v277_v8 = vpop.permute.xlu0 %276 }
  0x95   :  { %v272_v11 = vpop.permute.xlu1 %271 }
  0x97   :  { %v267_v15 = vpop.permute.xlu0 %266 }
  0x99   :  { %v377_v22 = vpop.permute.xlu1 %376 }
  0xc4   :  { %v521_v27 = vpop.f32.mrf.mxu0 }
  0xc5   :  { %v205_v61 = vadd.f32 %v521_v27, %v56_v57 }
  0xc6   :  { %v199_v28 = vpop.f32.mrf.mxu0 }
  0xc7   :  { %v200_v63 = vadd.f32 %v199_v28, %v51_v60  ;;  %v249_v1 = vmax.f32 %v205_v61, 0.0 }
  0xc8   :  { %v524_v30 = vpop.f32.mrf.mxu0 }
  0xc9   :  { %v215_v55 = vadd.f32 %v524_v30, %v66_v49  ;;  %v248_v2 = vmax.f32 %v200_v63, 0.0 }
  0xca   :  { %v209_v32 = vpop.f32.mrf.mxu0 }
  0xcb   :  { %v210_v58 = vadd.f32 %v209_v32, %v61_v52  ;;  %v251_v62 = vmax.f32 %v215_v55, 0.0 }
  0xcc   :  { %v527_v33 = vpop.f32.mrf.mxu0 }
  0xcd   :  { %v225_v50 = vadd.f32 %v527_v33, %v76_v39  ;;  %v250_v0 = vmax.f32 %v210_v58, 0.0 }
  0xce   :  { %v219_v35 = vpop.f32.mrf.mxu0 }
  0xcf   :  { %v220_v53 = vadd.f32 %v219_v35, %v71_v42  ;;  %v253_v56 = vmax.f32 %v225_v50, 0.0 }
  0xd0   :  { %v530_v37 = vpop.f32.mrf.mxu0 }
  0xd1   :  { %v235_v44 = vadd.f32 %v530_v37, %v86_v31  ;;  %v252_v59 = vmax.f32 %v220_v53, 0.0 }
  0xd2   :  { %v229_v38 = vpop.f32.mrf.mxu0 }
  0xd3   :  { %v230_v47 = vadd.f32 %v229_v38, %v81_v36  ;;  %v255_v51 = vmax.f32 %v235_v44, 0.0 }
  0xd4   :  { %v533_v40 = vpop.f32.mrf.mxu0 }
  0xd5   :  { %v245_v41 = vadd.f32 %v533_v40, %v96_v29  ;;  %v254_v54 = vmax.f32 %v230_v47, 0.0 }
  0xd6   :  { %v239_v43 = vpop.f32.mrf.mxu0 }
  0xd7   :  { %v257_v45 = vmax.f32 %v245_v41, 0.0  ;;  %v240_v46 = vadd.f32 %v239_v43, %v91_v34 }
  0xd9   :  { %v256_v48 = vmax.f32 %v240_v46, 0.0  ;;  %535 = vmatpush3.msra.mxu1 %v257_v45 }
  0xda   :  { %536 = vmatprep.subr.mxu1 %v601_v26 }
  0xdb   :  { %537 = vmatpush3.msra.mxu1 %v256_v48 }
  0xdc   :  { %538 = vmatprep.subr.mxu1 %v601_v26 }
  0xdd   :  { %539 = vmatpush3.msra.mxu1 %v255_v51 }
  0xde   :  { %540 = vmatprep.subr.mxu1 %v601_v26 }
  0xdf   :  { %541 = vmatpush3.msra.mxu1 %v254_v54 }
  0xe0   :  { %542 = vmatprep.subr.mxu1 %v601_v26 }
  0xe1   :  { %543 = vmatpush3.msra.mxu1 %v253_v56 }
  0xe2   :  { %544 = vmatprep.subr.mxu1 %v601_v26 }
  0xe3   :  { %545 = vmatpush3.msra.mxu1 %v252_v59 }
  0xe4   :  { %546 = vmatprep.subr.mxu1 %v601_v26 }
  0xe5   :  { %547 = vmatpush3.msra.mxu1 %v251_v62 }
  0xe6   :  { %548 = vmatprep.subr.mxu1 %v601_v26 }
  0xe7   :  { %549 = vmatpush3.msra.mxu1 %v250_v0 }
  0xe8   :  { %550 = vmatprep.subr.mxu1 %v601_v26 }
  0xe9   :  { %551 = vmatpush3.msra.mxu1 %v249_v1 }
  0xea   :  { %552 = vmatprep.subr.mxu1 %v601_v26 }
  0xeb   :  { %553 = vmatpush3.msra.mxu1 %v248_v2 }
  0xec   :  { %555 = vmatmul.mubr.msk.f32.vlgmr.msra.gmra.mxu1 %vm279_vm3, %v258_v3 }
  0xed   :  { %557 = vmatprep.mubr.msk.f32.mxu1 %vm602_vm2, %v601_v26 }
  0xf0   :  { %558 = vmatmul.mubr.msk.f32.gmra.mxu1 %vm279_vm3, %v259_v4 }
  0xf1   :  { %560 = vmatprep.mubr.msk.f32.mxu1 %vm602_vm2, %v601_v26 }
  0xf4   :  { %561 = vmatmul.mubr.msk.f32.gmra.mxu1 %vm279_vm3, %v260_v5 }
 0x1ac   :  { %v355_v6 = vpop.f32.mrf.mxu1 }
 0x1ad   :  { %v356_v17 = vadd.f32 %v355_v6, %v267_v15 }
 0x1ae   :  { %v556_v7 = vpop.f32.mrf.mxu1 }
 0x1af   :  { %v369_v20 = vmax.f32 %v356_v17, 0.0 }
 0x1b0   :  { %v360_v9 = vpop.f32.mrf.mxu1 }
 0x1b1   :  { %v361_v13 = vadd.f32 %v360_v9, %v272_v11 }
 0x1b2   :  { %v559_v10 = vpop.f32.mrf.mxu1 }
 0x1b3   :  { %v370_v19 = vmax.f32 %v361_v13, 0.0 }
 0x1b4   :  { %v365_v12 = vpop.f32.mrf.mxu1 }
 0x1b5   :  { %v366_v14 = vadd.f32 %v365_v12, %v277_v8 }
 0x1b6   :  { %v562_v16 = vpop.f32.mrf.mxu1 }
 0x1b7   :  { %v371_v18 = vmax.f32 %v366_v14, 0.0 }
 0x1b9   :  { %564 = vmatpush3.msk.msra.mxu0 %vm383_vm4, %v371_v18 }
 0x1ba   :  { %565 = vmatprep.subr.mxu0 %v601_v26 }
 0x1bb   :  { %566 = vmatpush3.msra.mxu0 %v370_v19 }
 0x1bc   :  { %567 = vmatprep.subr.mxu0 %v601_v26 }
 0x1bd   :  { %568 = vmatpush3.msra.mxu0 %v369_v20 }
 0x1be   :  { %570 = vmatmul.mubr.msk.f32.vlgmr.msra.gmra.mxu0 %vm379_vm5, %v372_v21 }
 0x27e   :  { %v453_v23 = vpop.f32.mrf.mxu0 }
 0x27f   :  { %v454_v24 = vadd.f32 %v453_v23, %v377_v22 }
 0x280   :  { %v571_v25 = vpop.f32.mrf.mxu0 }
 0x281   :  { %458 = vst.msk [vmem:[#allocation2] sm:$0x3] %vm457_vm6, %v454_v24 }
 0x282   :  { %589 = shalt.err (!%p586_p4)
}
 0x283   :  { %468 = dma.vmem_to_hbm [thread:$0]  %s466_s30, 32, %s772_s7, [#allocation3]  }
 0x284   :  { %598 = dma.done.wait [#allocation3], 32  }
 0x285   :  { %599 = vsyncadd [#allocation3], 4294967264 }
 0x286   :  { %472 = vsyncpa [#allocation3], 1 }

</bundles_post_ra>
